<compile_context>
chip_gen: v7x
topology: tpu7x:2x2x1
jax: 0.10.0
libtpu: 0.0.40
codegen_flags: <defaults>
</compile_context>

<pallas_src>
import jax
import jax.numpy as jnp
from jax.experimental import pallas as pl
from jax.experimental.pallas import tpu as pltpu

# ----------------------------- true / padded dims -----------------------------
D_IN, D_H1, D_H2, D_H3, D_OUT = 52, 250, 500, 250, 50
# P_IN holds 75 flattened pose dims (x,y,z per keypoint) + 2 dist dims, padded.
P_IN, P_H1, P_H2, P_H3, P_OUT = 128, 256, 512, 256, 128


def _round_up(x, m):
    return (x + m - 1) // m * m


# --------------------------------- kernel ------------------------------------
def _fight2_kernel(x_ref, w1_ref, w2_ref, w3_ref, w4_ref, b_ref, o_ref):
    """(tile_b, P_IN) f32 -> (tile_b, P_OUT) f32. bf16 matmul operands, f32 accum."""
    f32, bf16 = jnp.float32, jnp.bfloat16
    x = x_ref[...].astype(bf16)
    h = jnp.tanh(jnp.dot(x, w1_ref[...], preferred_element_type=f32)
                 + b_ref[0:1, 0:P_H1])
    h = jnp.tanh(jnp.dot(h.astype(bf16), w2_ref[...], preferred_element_type=f32)
                 + b_ref[1:2, 0:P_H2])
    h = jnp.tanh(jnp.dot(h.astype(bf16), w3_ref[...], preferred_element_type=f32)
                 + b_ref[2:3, 0:P_H3])
    o_ref[...] = (jnp.dot(h.astype(bf16), w4_ref[...], preferred_element_type=f32)
                  + b_ref[3:4, 0:P_OUT])


# --------------------------------- wrapper ------------------------------------
@jax.jit
def fight2_forward(active_pose, dist, packed_params):
    """active_pose: (B, 25, 3) f32, dist: (B, 2) f32 -> (B, 25, 2) f32."""
    w1p, w2p, w3p, w4p, biases = packed_params
    b = active_pose.shape[0]

    # Minimal glue: contiguous flatten (free) + concat + one pad.  The x/y
    # keypoint selection is folded into w1p's row layout (z rows are zero).
    pose_flat = active_pose.reshape(b, 75)
    x = jnp.concatenate([pose_flat, dist], axis=1)            # (b, 77)

    tile_b = min(128, _round_up(b, 8))
    b_pad = _round_up(b, tile_b)
    x = jnp.pad(x, ((0, b_pad - b), (0, P_IN - 77)))          # (b_pad, P_IN)

    grid = (b_pad // tile_b,)
    batch_spec = lambda w: pl.BlockSpec((tile_b, w), lambda i: (i, 0))
    resident = lambda s: pl.BlockSpec(s, lambda i: (0, 0))    # fetched once, stays in VMEM

    out_pad = pl.pallas_call(
        _fight2_kernel,
        out_shape=jax.ShapeDtypeStruct((b_pad, P_OUT), jnp.float32),
        grid=grid,
        in_specs=[
            batch_spec(P_IN),            # x            (b_pad, 128) f32
            resident((P_IN, P_H1)),      # w1  packed   (128, 256)  bf16
            resident((P_H1, P_H2)),      # w2           (256, 512)  bf16
            resident((P_H2, P_H3)),      # w3           (512, 256)  bf16
            resident((P_H3, P_OUT)),     # w4           (256, 128)  bf16
            resident((4, P_H2)),         # packed biases (4, 512)   f32
        ],
        out_specs=batch_spec(P_OUT),
        compiler_params=pltpu.CompilerParams(
            dimension_semantics=("parallel",),   # batch tiles -> both TCs on v7x
            vmem_limit_bytes=8 << 20,            # ~1.6 MiB resident; << v7x's 64 MiB
        ),
    )(x, w1p, w2p, w3p, w4p, biases)

    return out_pad[:b, :D_OUT].reshape(b, 25, 2)


# ------------------------------ parameter setup -------------------------------
def pack_params(logical):
    """nn.Linear-shaped f32 params -> kernel layout (bf16 weights, packed f32 biases)."""
    (w1, b1), (w2, b2), (w3, b3), (w4, b4) = logical
    bf16 = jnp.bfloat16

    # Kernel input layout: x[:, 3k + c] = active_pose[:, k, c], x[:, 75 + j] = dist[:, j].
    # Original fight_input:   [:, 2k + c] = active_pose[:, k, c] (c<2), [:, 50 + j] = dist.
    kp_rows = (jnp.arange(50) // 2) * 3 + (jnp.arange(50) % 2)
    w1p = jnp.zeros((P_IN, P_H1), jnp.float32)
    w1p = w1p.at[kp_rows, :D_H1].set(w1[:50])     # x,y rows; z rows stay zero
    w1p = w1p.at[75, :D_H1].set(w1[50])           # dist[0]
    w1p = w1p.at[76, :D_H1].set(w1[51])           # dist[1]

    w2p = jnp.zeros((P_H1, P_H2), jnp.float32).at[:D_H1, :D_H2].set(w2)
    w3p = jnp.zeros((P_H2, P_H3), jnp.float32).at[:D_H2, :D_H3].set(w3)
    w4p = jnp.zeros((P_H3, P_OUT), jnp.float32).at[:D_H3, :D_OUT].set(w4)

    biases = jnp.zeros((4, P_H2), jnp.float32)
    biases = (biases.at[0, :D_H1].set(b1)
                    .at[1, :D_H2].set(b2)
                    .at[2, :D_H3].set(b3)
                    .at[3, :D_OUT].set(b4))

    return (w1p.astype(bf16), w2p.astype(bf16), w3p.astype(bf16),
            w4p.astype(bf16), biases)


def init_params(key):
    """Deterministic init matching the nn.Linear shapes; returns (logical, packed)."""
    dims = [(D_IN, D_H1), (D_H1, D_H2), (D_H2, D_H3), (D_H3, D_OUT)]
    logical = []
    for i, (din, dout) in enumerate(dims):
        kw, kb = jax.random.split(jax.random.fold_in(key, i))
        bound = 1.0 / (din ** 0.5)   # PyTorch nn.Linear default uniform bound
        w = jax.random.uniform(kw, (din, dout), jnp.float32, -bound, bound)
        bvec = jax.random.uniform(kb, (dout,), jnp.float32, -bound, bound)
        logical.append((w, bvec))
    return logical, pack_params(logical)


# -------------------------------- reference -----------------------------------
def reference_forward(active_pose, dist, logical):
    """Original PyTorch data flow, mirroring the kernel's bf16 matmul operands."""
    (w1, b1), (w2, b2), (w3, b3), (w4, b4) = logical
    f32, bf16 = jnp.float32, jnp.bfloat16
    b = active_pose.shape[0]
    kp = active_pose[:, :, 0:2].reshape(b, 50)
    x = jnp.concatenate([kp, dist], axis=1)                       # (b, 52)
    h = jnp.tanh(jnp.dot(x.astype(bf16), w1.astype(bf16),
                         preferred_element_type=f32) + b1)
    h = jnp.tanh(jnp.dot(h.astype(bf16), w2.astype(bf16),
                         preferred_element_type=f32) + b2)
    h = jnp.tanh(jnp.dot(h.astype(bf16), w3.astype(bf16),
                         preferred_element_type=f32) + b3)
    o = jnp.dot(h.astype(bf16), w4.astype(bf16),
                preferred_element_type=f32) + b4
    return o.reshape(b, 25, 2)


if __name__ == "__main__":
    key = jax.random.PRNGKey(0)
    k_pose, k_dist, k_param = jax.random.split(key, 3)

    logical, packed = init_params(k_param)

    # Small case (B=2) plus a multi-tile case (B=200) to exercise the batch grid.
    for b in (2, 200):
        active_pose = jax.random.normal(jax.random.fold_in(k_pose, b),
                                        (b, 25, 3), jnp.float32)
        dist = jax.random.normal(jax.random.fold_in(k_dist, b),
                                 (b, 2), jnp.float32)

        out = jax.block_until_ready(fight2_forward(active_pose, dist, packed))
        assert out.shape == (b, 25, 2), out.shape

        ref = reference_forward(active_pose, dist, logical)
        max_err = float(jnp.max(jnp.abs(out - ref)))
        assert jnp.allclose(out, ref, atol=2e-3, rtol=2e-3), max_err

    print("KERNEL_OK")
</pallas_src>

<mosaic_0001>
module attributes {stable_mosaic.version = 11 : i64} {
  func.func @_fight2_kernel(%arg0: i32, %arg1: memref<8x128xf32, #tpu.memory_space<vmem>>, %arg2: memref<128x256xbf16, #tpu.memory_space<vmem>>, %arg3: memref<256x512xbf16, #tpu.memory_space<vmem>>, %arg4: memref<512x256xbf16, #tpu.memory_space<vmem>>, %arg5: memref<256x128xbf16, #tpu.memory_space<vmem>>, %arg6: memref<4x512xf32, #tpu.memory_space<vmem>>, %arg7: memref<8x128xf32, #tpu.memory_space<vmem>>) attributes {dimension_semantics = [#tpu.dimension_semantics<parallel>], iteration_bounds = array<i64: 1>, scalar_prefetch = 0 : i64, scratch_operands = 0 : i64, tpu.core_type = #tpu.core_type<tc>, window_params = [{transform_indices = @transform_0, window_bounds = array<i64: 8, 128>}, {pipeline_mode = #tpu.pipeline_mode<synchronous>, transform_indices = @transform_1, window_bounds = array<i64: 128, 256>}, {pipeline_mode = #tpu.pipeline_mode<synchronous>, transform_indices = @transform_2, window_bounds = array<i64: 256, 512>}, {pipeline_mode = #tpu.pipeline_mode<synchronous>, transform_indices = @transform_3, window_bounds = array<i64: 512, 256>}, {pipeline_mode = #tpu.pipeline_mode<synchronous>, transform_indices = @transform_4, window_bounds = array<i64: 256, 128>}, {pipeline_mode = #tpu.pipeline_mode<synchronous>, transform_indices = @transform_5, window_bounds = array<i64: 4, 512>}, {transform_indices = @transform_6, window_bounds = array<i64: 8, 128>}]} {
    %c0 = arith.constant 0 : index
    %c0_0 = arith.constant 0 : index
    %0 = vector.load %arg1[%c0, %c0_0] : memref<8x128xf32, #tpu.memory_space<vmem>>, vector<8x128xf32>
    %1 = arith.truncf %0 : vector<8x128xf32> to vector<8x128xbf16>
    %c0_1 = arith.constant 0 : index
    %c0_2 = arith.constant 0 : index
    %2 = vector.load %arg2[%c0_1, %c0_2] : memref<128x256xbf16, #tpu.memory_space<vmem>>, vector<128x256xbf16>
    %cst = arith.constant dense<0.000000e+00> : vector<8x256xf32>
    %3 = tpu.matmul %1, %2, %cst {dimension_numbers = #tpu.dot_dimension_numbers<[1], [0], [0], [1], [0, 0, 1, 1], [], []>} : vector<8x128xbf16>, vector<128x256xbf16>, vector<8x256xf32> -> vector<8x256xf32>
    %c0_3 = arith.constant 0 : index
    %c0_4 = arith.constant 0 : index
    %4 = vector.load %arg6[%c0_3, %c0_4] : memref<4x512xf32, #tpu.memory_space<vmem>>, vector<1x256xf32>
    %5 = vector.broadcast %4 : vector<1x256xf32> to vector<8x256xf32>
    %6 = arith.addf %3, %5 : vector<8x256xf32>
    %7 = math.tanh %6 : vector<8x256xf32>
    %8 = arith.truncf %7 : vector<8x256xf32> to vector<8x256xbf16>
    %c0_5 = arith.constant 0 : index
    %c0_6 = arith.constant 0 : index
    %9 = vector.load %arg3[%c0_5, %c0_6] : memref<256x512xbf16, #tpu.memory_space<vmem>>, vector<256x512xbf16>
    %cst_7 = arith.constant dense<0.000000e+00> : vector<8x512xf32>
    %10 = tpu.matmul %8, %9, %cst_7 {dimension_numbers = #tpu.dot_dimension_numbers<[1], [0], [0], [1], [0, 0, 1, 1], [], []>} : vector<8x256xbf16>, vector<256x512xbf16>, vector<8x512xf32> -> vector<8x512xf32>
    %c1 = arith.constant 1 : index
    %c0_8 = arith.constant 0 : index
    %11 = vector.load %arg6[%c1, %c0_8] : memref<4x512xf32, #tpu.memory_space<vmem>>, vector<1x512xf32>
    %12 = vector.broadcast %11 : vector<1x512xf32> to vector<8x512xf32>
    %13 = arith.addf %10, %12 : vector<8x512xf32>
    %14 = math.tanh %13 : vector<8x512xf32>
    %15 = arith.truncf %14 : vector<8x512xf32> to vector<8x512xbf16>
    %c0_9 = arith.constant 0 : index
    %c0_10 = arith.constant 0 : index
    %16 = vector.load %arg4[%c0_9, %c0_10] : memref<512x256xbf16, #tpu.memory_space<vmem>>, vector<512x256xbf16>
    %cst_11 = arith.constant dense<0.000000e+00> : vector<8x256xf32>
    %17 = tpu.matmul %15, %16, %cst_11 {dimension_numbers = #tpu.dot_dimension_numbers<[1], [0], [0], [1], [0, 0, 1, 1], [], []>} : vector<8x512xbf16>, vector<512x256xbf16>, vector<8x256xf32> -> vector<8x256xf32>
    %c2 = arith.constant 2 : index
    %c0_12 = arith.constant 0 : index
    %18 = vector.load %arg6[%c2, %c0_12] : memref<4x512xf32, #tpu.memory_space<vmem>>, vector<1x256xf32>
    %19 = vector.broadcast %18 : vector<1x256xf32> to vector<8x256xf32>
    %20 = arith.addf %17, %19 : vector<8x256xf32>
    %21 = math.tanh %20 : vector<8x256xf32>
    %22 = arith.truncf %21 : vector<8x256xf32> to vector<8x256xbf16>
    %c0_13 = arith.constant 0 : index
    %c0_14 = arith.constant 0 : index
    %23 = vector.load %arg5[%c0_13, %c0_14] : memref<256x128xbf16, #tpu.memory_space<vmem>>, vector<256x128xbf16>
    %cst_15 = arith.constant dense<0.000000e+00> : vector<8x128xf32>
    %24 = tpu.matmul %22, %23, %cst_15 {dimension_numbers = #tpu.dot_dimension_numbers<[1], [0], [0], [1], [0, 0, 1, 1], [], []>} : vector<8x256xbf16>, vector<256x128xbf16>, vector<8x128xf32> -> vector<8x128xf32>
    %c3 = arith.constant 3 : index
    %c0_16 = arith.constant 0 : index
    %25 = vector.load %arg6[%c3, %c0_16] : memref<4x512xf32, #tpu.memory_space<vmem>>, vector<1x128xf32>
    %26 = vector.broadcast %25 : vector<1x128xf32> to vector<8x128xf32>
    %27 = arith.addf %24, %26 : vector<8x128xf32>
    %c0_17 = arith.constant 0 : index
    %c0_18 = arith.constant 0 : index
    %28 = vector.load %arg7[%c0_17, %c0_18] : memref<8x128xf32, #tpu.memory_space<vmem>>, vector<8x128xf32>
    tpu.vector_store %arg7[%c0_17, %c0_18], %27 {strides = array<i32>} : memref<8x128xf32, #tpu.memory_space<vmem>>, vector<8x128xf32>,
    return
  }
  func.func @transform_0(%arg0: i32) -> (i32, i32) {
    %c0_i32 = arith.constant 0 : i32
    %c0_i32_0 = arith.constant 0 : i32
    return %arg0, %c0_i32 : i32, i32
  }
  func.func @transform_1(%arg0: i32) -> (i32, i32) {
    %c0_i32 = arith.constant 0 : i32
    %c0_i32_0 = arith.constant 0 : i32
    %c0_i32_1 = arith.constant 0 : i32
    return %c0_i32, %c0_i32_0 : i32, i32
  }
  func.func @transform_2(%arg0: i32) -> (i32, i32) {
    %c0_i32 = arith.constant 0 : i32
    %c0_i32_0 = arith.constant 0 : i32
    %c0_i32_1 = arith.constant 0 : i32
    return %c0_i32, %c0_i32_0 : i32, i32
  }
  func.func @transform_3(%arg0: i32) -> (i32, i32) {
    %c0_i32 = arith.constant 0 : i32
    %c0_i32_0 = arith.constant 0 : i32
    %c0_i32_1 = arith.constant 0 : i32
    return %c0_i32, %c0_i32_0 : i32, i32
  }
  func.func @transform_4(%arg0: i32) -> (i32, i32) {
    %c0_i32 = arith.constant 0 : i32
    %c0_i32_0 = arith.constant 0 : i32
    %c0_i32_1 = arith.constant 0 : i32
    return %c0_i32, %c0_i32_0 : i32, i32
  }
  func.func @transform_5(%arg0: i32) -> (i32, i32) {
    %c0_i32 = arith.constant 0 : i32
    %c0_i32_0 = arith.constant 0 : i32
    %c0_i32_1 = arith.constant 0 : i32
    return %c0_i32, %c0_i32_0 : i32, i32
  }
  func.func @transform_6(%arg0: i32) -> (i32, i32) {
    %c0_i32 = arith.constant 0 : i32
    %c0_i32_0 = arith.constant 0 : i32
    return %arg0, %c0_i32 : i32, i32
  }
}

</mosaic_0001>

<bundles_post_ra>
// kernel: fight2_forward.1
= control target key start
LH: loop header
LB: loop body
LE: loop exit
PB: predicated region body
PF: predicated region fallthrough
CT: control target
= control target key end

     0   :  { %11 = vsyncpa [#allocation3], 0  ;;  %s2071_s0 = inlined_call_operand.vmem [shape: f32[8,128], index: 0, kind: input, shape index: {}]   ;;  %s2072_s1 = inlined_call_operand.vmem [shape: bf16[128,256], index: 1, kind: input, shape index: {}]   ;;  %s2073_s2 = inlined_call_operand.hbm [shape: bf16[256,512], index: 2, kind: input, shape index: {}]   ;;  %s2074_s3 = inlined_call_operand.hbm [shape: bf16[512,256], index: 3, kind: input, shape index: {}]   ;;  %s2075_s4 = inlined_call_operand.hbm [shape: bf16[256,128], index: 4, kind: input, shape index: {}]   ;;  %s2076_s5 = inlined_call_operand.vmem [shape: f32[4,512], index: 5, kind: input, shape index: {}]   ;;  %s2077_s6 = inlined_call_operand.vmem [shape: f32[8,128], index: 6, kind: output, shape index: {}]  }
   0x1   :  { %12 = vsyncpa [#allocation5], 0  ;;  %s1899_s21 = smov [#allocation4]   ;;  %s1829_s25 = scalar_lea.hbm %s2074_s3, 8192 }
   0x2   :  { %s34_s22 = sshll.u32 %s1899_s21, 4  ;;  %p1830_p0 = scmp.ne.s32.totalorder %s2074_s3, %s1829_s25  ;;  %s35_s22 = int_to_ptr.vmem [resolvable:$true] %s34_s22 }
   0x3   :  { %p1833_p1 = scmp.lt.u32.totalorder %s1829_s25, %s2074_s3 }
   0x5   :  { %p1835_p2 = pnand %p1833_p1, %p1830_p0 }
   0x7   :  { %1838 = shalt.err (!%p1835_p2)
}
   0x8   :  { %s1839_s30 = scalar_lea.vmem %s35_s22, 8192  ;;  %p1844_p4 = scmp.lt.s32.totalorder %s35_s22, %s35_s22 }
   0x9   :  { %p1840_p3 = scmp.ne.s32.totalorder %s35_s22, %s1839_s30  ;;  %p1845_p5 = scmp.lt.s32.totalorder %s1839_s30, %s1839_s30 }
   0xb   :  { %p1846_p6 = por %p1845_p5, %p1844_p4 }
   0xd   :  { %p1847_p7 = pnand %p1846_p6, %p1840_p3 }
   0xf   :  { %1850 = shalt.err (!%p1847_p7)
}
  0x10   :  { %s1900_s7 = smov 128   ;;  %s1901_s8 = smov 8  }
  0x11   :  { %40 = dma.hbm_to_vmem [thread:$0]  %s2074_s3, 8192, %s35_s22, [#allocation5], %s1900_s7, %s1900_s7, %s1901_s8  }
  0x12   :  { %s1902_s11 = smov [#allocation2]   ;;  %s1851_s15 = scalar_lea.hbm %s2073_s2, 8192 }
  0x13   :  { %s22_s12 = sshll.u32 %s1902_s11, 4  ;;  %p1852_p8 = scmp.ne.s32.totalorder %s2073_s2, %s1851_s15  ;;  %s23_s12 = int_to_ptr.vmem [resolvable:$true] %s22_s12 }
  0x14   :  { %p1855_p9 = scmp.lt.u32.totalorder %s1851_s15, %s2073_s2 }
  0x16   :  { %p1857_p10 = pnand %p1855_p9, %p1852_p8 }
  0x18   :  { %1860 = shalt.err (!%p1857_p10)
}
  0x19   :  { %s1861_s20 = scalar_lea.vmem %s23_s12, 8192  ;;  %p1866_p12 = scmp.lt.s32.totalorder %s23_s12, %s23_s12 }
  0x1a   :  { %p1862_p11 = scmp.ne.s32.totalorder %s23_s12, %s1861_s20  ;;  %p1867_p13 = scmp.lt.s32.totalorder %s1861_s20, %s1861_s20 }
  0x1c   :  { %p1868_p0 = por %p1867_p13, %p1866_p12 }
  0x1e   :  { %p1869_p1 = pnand %p1868_p0, %p1862_p11 }
  0x20   :  { %1872 = shalt.err (!%p1869_p1)
}
  0x21   :  { %s1903_s3 = smov 256   ;;  %s1904_s21 = smov 16  }
  0x22   :  { %28 = dma.hbm_to_vmem [thread:$0]  %s2073_s2, 8192, %s23_s12, [#allocation3], %s1903_s3, %s1903_s3, %s1904_s21  }
  0x23   :  { %s1905_s24 = smov [#allocation6]   ;;  %s1873_s28 = scalar_lea.hbm %s2075_s4, 2048 }
  0x24   :  { %s46_s25 = sshll.u32 %s1905_s24, 4  ;;  %p1874_p2 = scmp.ne.s32.totalorder %s2075_s4, %s1873_s28  ;;  %s47_s25 = int_to_ptr.vmem [resolvable:$true] %s46_s25 }
  0x25   :  { %p1877_p3 = scmp.lt.u32.totalorder %s1873_s28, %s2075_s4 }
  0x27   :  { %p1879_p4 = pnand %p1877_p3, %p1874_p2 }
  0x29   :  { %1882 = shalt.err (!%p1879_p4)
}
  0x2a   :  { %s1883_s9 = scalar_lea.vmem %s47_s25, 2048  ;;  %p1888_p6 = scmp.lt.s32.totalorder %s47_s25, %s47_s25 }
  0x2b   :  { %p1884_p5 = scmp.ne.s32.totalorder %s47_s25, %s1883_s9  ;;  %p1889_p7 = scmp.lt.s32.totalorder %s1883_s9, %s1883_s9 }
  0x2d   :  { %p1890_p8 = por %p1889_p7, %p1888_p6 }
  0x2f   :  { %p1891_p9 = pnand %p1890_p8, %p1884_p5 }
  0x31   :  { %1894 = shalt.err (!%p1891_p9)
}
  0x32   :  { %s1906_s2 = smov 64   ;;  %s1907_s10 = smov 4  }
  0x33   :  { %52 = dma.hbm_to_vmem [thread:$0]  %s2075_s4, 2048, %s47_s25, [#allocation5], %s1906_s2, %s1906_s2, %s1907_s10  }
  0x34   :  { %1895 = dma.done.wait [#allocation3], 8192  }
  0x35   :  { %1896 = vsyncadd [#allocation3], 4294959104 }
  0x36   :  { %1897 = dma.done.wait [#allocation5], 10240  }
  0x37   :  { %1898 = vsyncadd [#allocation5], 4294957056  ;;  %v1908_v0 = vmov 0   ;;  %v1581_v1 = vld [vmem:[%s2072_s1 + $0x4] ss:$8 sps:$4 sm:$0xff]  }
  0x38   :  { %207 = vmatprep.mubr.bf16.mxu0 %v1908_v0  ;;  %v1583_v2 = vld [vmem:[%s2072_s1] ss:$8 sps:$4 sm:$0xff]   ;;  %175 = vmatprep.subr.bf16.mxu0 %v1581_v1  ;;  %v1584_v3 = vld [vmem:[%s2072_s1 + $0x14] ss:$8 sps:$4 sm:$0xff]   ;;  %v1586_v4 = vld [vmem:[%s2072_s1 + $0x10] ss:$8 sps:$4 sm:$0xff]  }
  0x39   :  { %176 = vmatpush1.bf16.msra.mxu0 %v1583_v2  ;;  %v1587_v5 = vld [vmem:[%s2072_s1 + $0x24] ss:$8 sps:$4 sm:$0xff]   ;;  %v1589_v6 = vld [vmem:[%s2072_s1 + $0x20] ss:$8 sps:$4 sm:$0xff]   ;;  %v1590_v7 = vld [vmem:[%s2072_s1 + $0x34] ss:$8 sps:$4 sm:$0xff]  }
  0x3a   :  { %177 = vmatprep.subr.bf16.mxu0 %v1584_v3  ;;  %v1592_v8 = vld [vmem:[%s2072_s1 + $0x30] ss:$8 sps:$4 sm:$0xff]   ;;  %v1605_v9 = vld [vmem:[#allocation2 + $0x4] ss:$16 sps:$4 sm:$0xff]   ;;  %v1595_v13 = vld [vmem:[%s2072_s1 + $0x40] ss:$8 sps:$4 sm:$0xff]  }
  0x3b   :  { %v1593_v10 = vld [vmem:[%s2072_s1 + $0x44] ss:$8 sps:$4 sm:$0xff]   ;;  %627 = vmatprep.subr.bf16.mxu1 %v1605_v9  ;;  %v1610_v11 = vld [vmem:[#allocation2] ss:$16 sps:$4 sm:$0xff]   ;;  %v1596_v14 = vld [vmem:[%s2072_s1 + $0x54] ss:$8 sps:$4 sm:$0xff]  }
  0x3c   :  { %v1611_v12 = vld [vmem:[#allocation2 + $0x24] ss:$16 sps:$4 sm:$0xff]   ;;  %628 = vmatpush1.bf16.msra.mxu1 %v1610_v11  ;;  %v1616_v15 = vld [vmem:[#allocation2 + $0x20] ss:$16 sps:$4 sm:$0xff]   ;;  %v1609_v27 = vld [vmem:[#allocation2 + $0xc] ss:$16 sps:$4 sm:$0xff]  }
  0x3d   :  { %178 = vmatpush1.bf16.msra.mxu0 %v1586_v4  ;;  %629 = vmatprep.subr.bf16.mxu1 %v1611_v12  ;;  %v1617_v16 = vld [vmem:[#allocation2 + $0x44] ss:$16 sps:$4 sm:$0xff]   ;;  %v1598_v17 = vld [vmem:[%s2072_s1 + $0x50] ss:$8 sps:$4 sm:$0xff]   ;;  %v1601_v21 = vld [vmem:[%s2072_s1 + $0x60] ss:$8 sps:$4 sm:$0xff]  }
  0x3e   :  { %179 = vmatprep.subr.bf16.mxu0 %v1587_v5  ;;  %v1599_v18 = vld [vmem:[%s2072_s1 + $0x64] ss:$8 sps:$4 sm:$0xff]   ;;  %v1622_v19 = vld [vmem:[#allocation2 + $0x40] ss:$16 sps:$4 sm:$0xff]   ;;  %v1602_v22 = vld [vmem:[%s2072_s1 + $0x74] ss:$8 sps:$4 sm:$0xff]  }
  0x3f   :  { %v1623_v20 = vld [vmem:[#allocation2 + $0x64] ss:$16 sps:$4 sm:$0xff]   ;;  %v1628_v23 = vld [vmem:[#allocation2 + $0x60] ss:$16 sps:$4 sm:$0xff]   ;;  %v1607_v31 = vld [vmem:[#allocation2 + $0x8] ss:$16 sps:$4 sm:$0xff]  }
  0x40   :  { %630 = vmatpush1.bf16.msra.mxu1 %v1616_v15  ;;  %v1629_v24 = vld [vmem:[#allocation2 + $0x84] ss:$16 sps:$4 sm:$0xff]   ;;  %v1604_v25 = vld [vmem:[%s2072_s1 + $0x70] ss:$8 sps:$4 sm:$0xff]   ;;  %v1615_v32 = vld [vmem:[#allocation2 + $0x2c] ss:$16 sps:$4 sm:$0xff]  }
  0x41   :  { %180 = vmatpush1.bf16.msra.mxu0 %v1589_v6  ;;  %631 = vmatprep.subr.bf16.mxu1 %v1617_v16  ;;  %v65_v26 = vld [vmem:[%s2071_s0] sm:$0xff]  ;;  %v1613_v35 = vld [vmem:[#allocation2 + $0x28] ss:$16 sps:$4 sm:$0xff]   ;;  %v1621_v36 = vld [vmem:[#allocation2 + $0x4c] ss:$16 sps:$4 sm:$0xff]  }
  0x42   :  { %181 = vmatprep.subr.bf16.mxu0 %v1590_v7  ;;  %v1634_v28 = vld [vmem:[#allocation2 + $0x80] ss:$16 sps:$4 sm:$0xff]   ;;  %v1635_v29 = vld [vmem:[#allocation2 + $0xa4] ss:$16 sps:$4 sm:$0xff]   ;;  %v66_v30 = vpack.c.bf16 %v65_v26, %v65_v26  ;;  %v1619_v39 = vld [vmem:[#allocation2 + $0x48] ss:$16 sps:$4 sm:$0xff]  }
  0x43   :  { %v1640_v33 = vld [vmem:[#allocation2 + $0xa0] ss:$16 sps:$4 sm:$0xff]   ;;  %v1641_v34 = vld [vmem:[#allocation2 + $0xc4] ss:$16 sps:$4 sm:$0xff]   ;;  %v1627_v40 = vld [vmem:[#allocation2 + $0x6c] ss:$16 sps:$4 sm:$0xff]  }
  0x44   :  { %632 = vmatpush1.bf16.msra.mxu1 %v1622_v19  ;;  %v1646_v37 = vld [vmem:[#allocation2 + $0xc0] ss:$16 sps:$4 sm:$0xff]   ;;  %v1647_v38 = vld [vmem:[#allocation2 + $0xe4] ss:$16 sps:$4 sm:$0xff]   ;;  %v1625_v43 = vld [vmem:[#allocation2 + $0x68] ss:$16 sps:$4 sm:$0xff]  }
  0x45   :  { %182 = vmatpush1.bf16.msra.mxu0 %v1592_v8  ;;  %633 = vmatprep.subr.bf16.mxu1 %v1623_v20  ;;  %v1652_v41 = vld [vmem:[#allocation2 + $0xe0] ss:$16 sps:$4 sm:$0xff]   ;;  %v1653_v42 = vld [vmem:[#allocation2 + $0x104] ss:$16 sps:$4 sm:$0xff]   ;;  %v1633_v44 = vld [vmem:[#allocation2 + $0x8c] ss:$16 sps:$4 sm:$0xff]   ;;  %v85_v20 = vlaneseq }
  0x46   :  { %183 = vmatprep.subr.bf16.mxu0 %v1593_v10  ;;  %v1658_v45 = vld [vmem:[#allocation2 + $0x100] ss:$16 sps:$4 sm:$0xff]   ;;  %v1659_v46 = vld [vmem:[#allocation2 + $0x124] ss:$16 sps:$4 sm:$0xff]   ;;  %v1631_v47 = vld [vmem:[#allocation2 + $0x88] ss:$16 sps:$4 sm:$0xff]  }
  0x47   :  { %v1664_v48 = vld [vmem:[#allocation2 + $0x120] ss:$16 sps:$4 sm:$0xff]   ;;  %v1639_v49 = vld [vmem:[#allocation2 + $0xac] ss:$16 sps:$4 sm:$0xff]   ;;  %v1665_v50 = vld [vmem:[#allocation2 + $0x144] ss:$16 sps:$4 sm:$0xff]  }
  0x48   :  { %634 = vmatpush1.bf16.msra.mxu1 %v1628_v23  ;;  %v1637_v51 = vld [vmem:[#allocation2 + $0xa8] ss:$16 sps:$4 sm:$0xff]   ;;  %v1670_v52 = vld [vmem:[#allocation2 + $0x140] ss:$16 sps:$4 sm:$0xff]   ;;  %v1645_v53 = vld [vmem:[#allocation2 + $0xcc] ss:$16 sps:$4 sm:$0xff]  }
  0x49   :  { %184 = vmatpush1.bf16.msra.mxu0 %v1595_v13  ;;  %635 = vmatprep.subr.bf16.mxu1 %v1629_v24  ;;  %v1671_v54 = vld [vmem:[#allocation2 + $0x164] ss:$16 sps:$4 sm:$0xff]   ;;  %v1643_v55 = vld [vmem:[#allocation2 + $0xc8] ss:$16 sps:$4 sm:$0xff]   ;;  %v1676_v56 = vld [vmem:[#allocation2 + $0x160] ss:$16 sps:$4 sm:$0xff]  }
  0x4a   :  { %185 = vmatprep.subr.bf16.mxu0 %v1596_v14  ;;  %v1651_v57 = vld [vmem:[#allocation2 + $0xec] ss:$16 sps:$4 sm:$0xff]   ;;  %v1649_v58 = vld [vmem:[#allocation2 + $0xe8] ss:$16 sps:$4 sm:$0xff]   ;;  %v1677_v3 = vld [vmem:[#allocation2 + $0x184] ss:$16 sps:$4 sm:$0xff]  }
  0x4b   :  { %v1657_v59 = vld [vmem:[#allocation2 + $0x10c] ss:$16 sps:$4 sm:$0xff]   ;;  %v1655_v60 = vld [vmem:[#allocation2 + $0x108] ss:$16 sps:$4 sm:$0xff]   ;;  %v1682_v6 = vld [vmem:[#allocation2 + $0x180] ss:$16 sps:$4 sm:$0xff]  }
  0x4c   :  { %636 = vmatpush1.bf16.msra.mxu1 %v1634_v28  ;;  %v1663_v61 = vld [vmem:[#allocation2 + $0x12c] ss:$16 sps:$4 sm:$0xff]   ;;  %v1661_v62 = vld [vmem:[#allocation2 + $0x128] ss:$16 sps:$4 sm:$0xff]   ;;  %v1683_v7 = vld [vmem:[#allocation2 + $0x1a4] ss:$16 sps:$4 sm:$0xff]  }
  0x4d   :  { %186 = vmatpush1.bf16.msra.mxu0 %v1598_v17  ;;  %637 = vmatprep.subr.bf16.mxu1 %v1635_v29  ;;  %v1669_v63 = vld [vmem:[#allocation2 + $0x14c] ss:$16 sps:$4 sm:$0xff]   ;;  %v1667_v0 = vld [vmem:[#allocation2 + $0x148] ss:$16 sps:$4 sm:$0xff]   ;;  %v1688_v10 = vld [vmem:[#allocation2 + $0x1a0] ss:$16 sps:$4 sm:$0xff]  }
  0x4e   :  { %187 = vmatprep.subr.bf16.mxu0 %v1599_v18  ;;  %v1675_v1 = vld [vmem:[#allocation2 + $0x16c] ss:$16 sps:$4 sm:$0xff]   ;;  %v1673_v2 = vld [vmem:[#allocation2 + $0x168] ss:$16 sps:$4 sm:$0xff]   ;;  %v1689_v11 = vld [vmem:[#allocation2 + $0x1c4] ss:$16 sps:$4 sm:$0xff]  }
  0x4f   :  { %v1681_v4 = vld [vmem:[#allocation2 + $0x18c] ss:$16 sps:$4 sm:$0xff]   ;;  %v1679_v5 = vld [vmem:[#allocation2 + $0x188] ss:$16 sps:$4 sm:$0xff]   ;;  %v1694_v14 = vld [vmem:[#allocation2 + $0x1c0] ss:$16 sps:$4 sm:$0xff]  }
  0x50   :  { %638 = vmatpush1.bf16.msra.mxu1 %v1640_v33  ;;  %v1687_v8 = vld [vmem:[#allocation2 + $0x1ac] ss:$16 sps:$4 sm:$0xff]   ;;  %v1685_v9 = vld [vmem:[#allocation2 + $0x1a8] ss:$16 sps:$4 sm:$0xff]   ;;  %v1695_v15 = vld [vmem:[#allocation2 + $0x1e4] ss:$16 sps:$4 sm:$0xff]  }
  0x51   :  { %188 = vmatpush1.bf16.msra.mxu0 %v1601_v21  ;;  %639 = vmatprep.subr.bf16.mxu1 %v1641_v34  ;;  %v1693_v12 = vld [vmem:[#allocation2 + $0x1cc] ss:$16 sps:$4 sm:$0xff]   ;;  %v1691_v13 = vld [vmem:[#allocation2 + $0x1c8] ss:$16 sps:$4 sm:$0xff]   ;;  %v1700_v18 = vld [vmem:[#allocation2 + $0x1e0] ss:$16 sps:$4 sm:$0xff]  }
  0x52   :  { %189 = vmatprep.subr.bf16.mxu0 %v1602_v22  ;;  %v1699_v16 = vld [vmem:[#allocation2 + $0x1ec] ss:$16 sps:$4 sm:$0xff]   ;;  %v1697_v17 = vld [vmem:[#allocation2 + $0x1e8] ss:$16 sps:$4 sm:$0xff]   ;;  %v2031_v21 = vshrl.u32 %v85_v20, 7 }
  0x53   :  { %v1703_v19 = vld [vmem:[#allocation4 + $0x4] ss:$8 sps:$4 sm:$0xff]  }
  0x54   :  { %640 = vmatpush1.bf16.msra.mxu1 %v1646_v37  ;;  %v2034_v22 = vsub.s32 0, %v2031_v21  ;;  %v83_v23 = vld [vmem:[%s2076_s5] ss:$4 sm:$0x3]  ;;  %v2040_v24 = vsub.s32 1, %v2031_v21 }
  0x55   :  { %190 = vmatpush1.bf16.msra.mxu0 %v1604_v25  ;;  %641 = vmatprep.subr.bf16.mxu1 %v1647_v38  ;;  %v1706_v38 = vld [vmem:[#allocation4 + $0x14] ss:$8 sps:$4 sm:$0xff]  }
  0x56   :  { %668 = vmatprep.subr.bf16.mxu0 %v1609_v27  ;;  %v88_v25 = vrot.slane %v83_v23, %v2034_v22  ;;  %v92_v26 = vrot.slane %v83_v23, %v2040_v24 }
  0x58   :  { %208 = vmatmul.mubr.bf16.vlgmr.msra.gmra.mrb[0].mxu0 %v66_v30  ;;  %642 = vmatpush1.bf16.msra.mxu1 %v1652_v41  ;;  %v1707_v41 = vld [vmem:[#allocation4 + $0x20] ss:$8 sps:$4 sm:$0xff]  }
  0x59   :  { %669 = vmatpush1.bf16.msra.mxu0 %v1607_v31  ;;  %643 = vmatprep.subr.bf16.mxu1 %v1653_v42  ;;  %v1712_v42 = vld [vmem:[#allocation4 + $0x34] ss:$8 sps:$4 sm:$0xff]  }
  0x5a   :  { %670 = vmatprep.subr.bf16.mxu0 %v1615_v32 }
  0x5c   :  { %644 = vmatpush1.bf16.msra.mxu1 %v1658_v45  ;;  %v1713_v45 = vld [vmem:[#allocation4 + $0x40] ss:$8 sps:$4 sm:$0xff]  }
  0x5d   :  { %671 = vmatpush1.bf16.msra.mxu0 %v1613_v35  ;;  %645 = vmatprep.subr.bf16.mxu1 %v1659_v46  ;;  %v1718_v46 = vld [vmem:[#allocation4 + $0x54] ss:$8 sps:$4 sm:$0xff]  }
  0x5e   :  { %672 = vmatprep.subr.bf16.mxu0 %v1621_v36  ;;  %v1701_v36 = vld [vmem:[#allocation4] ss:$8 sps:$4 sm:$0xff]  }
  0x60   :  { %646 = vmatpush1.bf16.msra.mxu1 %v1664_v48  ;;  %v1721_v48 = vld [vmem:[#allocation4 + $0x64] ss:$8 sps:$4 sm:$0xff]  }
  0x61   :  { %673 = vmatpush1.bf16.msra.mxu0 %v1619_v39  ;;  %647 = vmatprep.subr.bf16.mxu1 %v1665_v50  ;;  %v1704_v39 = vld [vmem:[#allocation4 + $0x10] ss:$8 sps:$4 sm:$0xff]   ;;  %v1724_v50 = vld [vmem:[#allocation4 + $0x74] ss:$8 sps:$4 sm:$0xff]  }
  0x62   :  { %674 = vmatprep.subr.bf16.mxu0 %v1627_v40  ;;  %v1709_v40 = vld [vmem:[#allocation4 + $0x24] ss:$8 sps:$4 sm:$0xff]  }
  0x64   :  { %648 = vmatpush1.bf16.msra.mxu1 %v1670_v52  ;;  %v1727_v52 = vld [vmem:[#allocation4 + $0x84] ss:$8 sps:$4 sm:$0xff]  }
  0x65   :  { %675 = vmatpush1.bf16.msra.mxu0 %v1625_v43  ;;  %649 = vmatprep.subr.bf16.mxu1 %v1671_v54  ;;  %v1710_v43 = vld [vmem:[#allocation4 + $0x30] ss:$8 sps:$4 sm:$0xff]   ;;  %v1730_v54 = vld [vmem:[#allocation4 + $0x94] ss:$8 sps:$4 sm:$0xff]  }
  0x66   :  { %676 = vmatprep.subr.bf16.mxu0 %v1633_v44  ;;  %v1715_v44 = vld [vmem:[#allocation4 + $0x44] ss:$8 sps:$4 sm:$0xff]  }
  0x68   :  { %650 = vmatpush1.bf16.msra.mxu1 %v1676_v56  ;;  %v1733_v56 = vld [vmem:[#allocation4 + $0xa4] ss:$8 sps:$4 sm:$0xff]  }
  0x69   :  { %677 = vmatpush1.bf16.msra.mxu0 %v1631_v47  ;;  %651 = vmatprep.subr.bf16.mxu1 %v1677_v3  ;;  %v1716_v47 = vld [vmem:[#allocation4 + $0x50] ss:$8 sps:$4 sm:$0xff]  }
  0x6a   :  { %678 = vmatprep.subr.bf16.mxu0 %v1639_v49  ;;  %v1719_v49 = vld [vmem:[#allocation4 + $0x60] ss:$8 sps:$4 sm:$0xff]   ;;  %v1746_v3 = vld [vmem:[#allocation4 + $0xf0] ss:$8 sps:$4 sm:$0xff]  }
  0x6c   :  { %652 = vmatpush1.bf16.msra.mxu1 %v1682_v6  ;;  %v1798_v6 = vld [vmem:[#allocation6] sm:$0xff]  }
  0x6d   :  { %679 = vmatpush1.bf16.msra.mxu0 %v1637_v51  ;;  %653 = vmatprep.subr.bf16.mxu1 %v1683_v7  ;;  %v1722_v51 = vld [vmem:[#allocation4 + $0x70] ss:$8 sps:$4 sm:$0xff]   ;;  %v1799_v7 = vld [vmem:[#allocation6 + $0x48] sm:$0xff]  }
  0x6e   :  { %680 = vmatprep.subr.bf16.mxu0 %v1645_v53  ;;  %v1725_v53 = vld [vmem:[#allocation4 + $0x80] ss:$8 sps:$4 sm:$0xff]  }
  0x70   :  { %654 = vmatpush1.bf16.msra.mxu1 %v1688_v10  ;;  %v1802_v10 = vld [vmem:[#allocation6 + $0x10] sm:$0xff]  }
  0x71   :  { %681 = vmatpush1.bf16.msra.mxu0 %v1643_v55  ;;  %655 = vmatprep.subr.bf16.mxu1 %v1689_v11  ;;  %v1728_v55 = vld [vmem:[#allocation4 + $0x90] ss:$8 sps:$4 sm:$0xff]  }
  0x72   :  { %682 = vmatprep.subr.bf16.mxu0 %v1651_v57  ;;  %v1731_v57 = vld [vmem:[#allocation4 + $0xa0] ss:$8 sps:$4 sm:$0xff]   ;;  %v1803_v11 = vld [vmem:[#allocation6 + $0x58] sm:$0xff]  }
  0x74   :  { %656 = vmatpush1.bf16.msra.mxu1 %v1694_v14  ;;  %v301_v14 = vsub.s32 3, %v2031_v21 }
  0x75   :  { %683 = vmatpush1.bf16.msra.mxu0 %v1649_v58  ;;  %657 = vmatprep.subr.bf16.mxu1 %v1695_v15  ;;  %v1736_v58 = vld [vmem:[#allocation4 + $0xb4] ss:$8 sps:$4 sm:$0xff]  }
  0x76   :  { %684 = vmatprep.subr.bf16.mxu0 %v1657_v59  ;;  %v1734_v59 = vld [vmem:[#allocation4 + $0xb0] ss:$8 sps:$4 sm:$0xff]  }
  0x78   :  { %658 = vmatpush1.bf16.msra.mxu1 %v1700_v18 }
  0x79   :  { %685 = vmatpush1.bf16.msra.mxu0 %v1655_v60  ;;  %1114 = vmatprep.subr.bf16.mxu1 %v1703_v19  ;;  %v1739_v60 = vld [vmem:[#allocation4 + $0xc4] ss:$8 sps:$4 sm:$0xff]  }
  0x7a   :  { %686 = vmatprep.subr.bf16.mxu0 %v1663_v61  ;;  %v1737_v61 = vld [vmem:[#allocation4 + $0xc0] ss:$8 sps:$4 sm:$0xff]  }
  0x7d   :  { %687 = vmatpush1.bf16.msra.mxu0 %v1661_v62  ;;  %v1742_v62 = vld [vmem:[#allocation4 + $0xd4] ss:$8 sps:$4 sm:$0xff]  }
  0x7e   :  { %688 = vmatprep.subr.bf16.mxu0 %v1669_v63  ;;  %v1740_v63 = vld [vmem:[#allocation4 + $0xd0] ss:$8 sps:$4 sm:$0xff]  }
  0x81   :  { %689 = vmatpush1.bf16.msra.mxu0 %v1667_v0  ;;  %v1745_v0 = vld [vmem:[#allocation4 + $0xe4] ss:$8 sps:$4 sm:$0xff]  }
  0x82   :  { %690 = vmatprep.subr.bf16.mxu0 %v1675_v1  ;;  %v1743_v1 = vld [vmem:[#allocation4 + $0xe0] ss:$8 sps:$4 sm:$0xff]  }
  0x85   :  { %691 = vmatpush1.bf16.msra.mxu0 %v1673_v2  ;;  %v1748_v2 = vld [vmem:[#allocation4 + $0xf4] ss:$8 sps:$4 sm:$0xff]  }
  0x86   :  { %692 = vmatprep.subr.bf16.mxu0 %v1681_v4  ;;  %v1751_v4 = vld [vmem:[#allocation4 + $0x104] ss:$8 sps:$4 sm:$0xff]  }
  0x89   :  { %693 = vmatpush1.bf16.msra.mxu0 %v1679_v5  ;;  %v1797_v5 = vld [vmem:[#allocation6 + $0x40] sm:$0xff]  }
  0x8a   :  { %694 = vmatprep.subr.bf16.mxu0 %v1687_v8  ;;  %v1800_v8 = vld [vmem:[#allocation6 + $0x8] sm:$0xff]  }
  0x8d   :  { %695 = vmatpush1.bf16.msra.mxu0 %v1685_v9  ;;  %v1801_v9 = vld [vmem:[#allocation6 + $0x50] sm:$0xff]  }
  0x8e   :  { %696 = vmatprep.subr.bf16.mxu0 %v1693_v12  ;;  %v1804_v12 = vld [vmem:[#allocation6 + $0x18] sm:$0xff]  }
  0x91   :  { %697 = vmatpush1.bf16.msra.mxu0 %v1691_v13  ;;  %v2047_v13 = vld [vmem:[%s2076_s5 + $0x1] ss:$4 sm:$0xf] }
  0x92   :  { %698 = vmatprep.subr.bf16.mxu0 %v1699_v16  ;;  %v290_v15 = vrot.slane %v2047_v13, %v2034_v22  ;;  %v294_v16 = vrot.slane %v2047_v13, %v2040_v24 }
  0x95   :  { %699 = vmatpush1.bf16.msra.mxu0 %v1697_v17  ;;  %v302_v17 = vrot.slane %v2047_v13, %v301_v14  ;;  %v1810_v14 = vld [vmem:[#allocation6 + $0x30] sm:$0xff]  }
  0x96   :  { %1543 = vmatprep.subr.bf16.mxu0 %v1797_v5  ;;  %v1796_v5 = vld [vmem:[#allocation4 + $0x1f4] ss:$8 sps:$4 sm:$0xff]  }
 0x12b   :  { %v209_v27 = vpop.f32.mrb[0].mxu0 }
 0x12c   :  { %v210_v28 = vadd.f32 %v209_v27, %v88_v25  ;;  %v211_v29 = vpop.f32.mrb[1].mxu0 }
 0x12d   :  { %v212_v30 = vadd.f32 %v211_v29, %v92_v26  ;;  %v213_v31 = vpop.f32.mrb[2].mxu0 }
 0x12e   :  { %1813 = vtanh.f32 %v210_v28  ;;  %v214_v32 = vpop.f32.mrb[3].mxu0 }
 0x12f   :  { %1815 = vtanh.f32 %v212_v30 }
 0x138   :  { %v1814_v33 = vpop.eup %1813 }
 0x139   :  { %v1816_v34 = vpop.eup %1815  ;;  %v218_v37 = vpack.c.bf16 %v1814_v33, %v1814_v33 }
 0x13a   :  { %v219_v35 = vpack.c.bf16 %v1816_v34, %v1816_v34 }
 0x13c   :  { %659 = vmatprep.mubr.bf16.mxu1 %v219_v35  ;;  %700 = vmatprep.mubr.bf16.mxu0 %v219_v35 }
 0x13d   :  { %660 = vmatmul.mubr.bf16.vlgmr.msra.gmra.mrb[0].mxu1 %v218_v37  ;;  %701 = vmatmul.mubr.bf16.vlgmr.msra.gmra.mrb[4].mxu0 %v218_v37 }
 0x13e   :  { %1115 = vmatpush1.bf16.msra.mxu1 %v1701_v36  ;;  %1544 = vmatpush3.bf16.msra.mxu0 %v1798_v6  ;;  %v1749_v36 = vld [vmem:[#allocation4 + $0x100] ss:$8 sps:$4 sm:$0xff]   ;;  %v1794_v6 = vld [vmem:[#allocation4 + $0x1f0] ss:$8 sps:$4 sm:$0xff]  }
 0x13f   :  { %1116 = vmatprep.subr.bf16.mxu1 %v1706_v38  ;;  %1545 = vmatprep.subr.bf16.mxu0 %v1799_v7  ;;  %v1754_v38 = vld [vmem:[#allocation4 + $0x114] ss:$8 sps:$4 sm:$0xff]  }
 0x142   :  { %1117 = vmatpush1.bf16.msra.mxu1 %v1704_v39  ;;  %1546 = vmatpush3.bf16.msra.mxu0 %v1800_v8 }
 0x143   :  { %1118 = vmatprep.subr.bf16.mxu1 %v1709_v40  ;;  %1547 = vmatprep.subr.bf16.mxu0 %v1801_v9  ;;  %v1752_v40 = vld [vmem:[#allocation4 + $0x110] ss:$8 sps:$4 sm:$0xff]   ;;  %v1805_v9 = vld [vmem:[#allocation6 + $0x60] sm:$0xff]  }
 0x146   :  { %1119 = vmatpush1.bf16.msra.mxu1 %v1707_v41  ;;  %1548 = vmatpush3.bf16.msra.mxu0 %v1802_v10  ;;  %v1757_v41 = vld [vmem:[#allocation4 + $0x124] ss:$8 sps:$4 sm:$0xff]  }
 0x147   :  { %1120 = vmatprep.subr.bf16.mxu1 %v1712_v42  ;;  %1549 = vmatprep.subr.bf16.mxu0 %v1803_v11  ;;  %v1755_v42 = vld [vmem:[#allocation4 + $0x120] ss:$8 sps:$4 sm:$0xff]  }
 0x148   :  { %v1806_v10 = vld [vmem:[#allocation6 + $0x20] sm:$0xff]   ;;  %v1807_v11 = vld [vmem:[#allocation6 + $0x68] sm:$0xff]  }
 0x14a   :  { %1121 = vmatpush1.bf16.msra.mxu1 %v1710_v43  ;;  %1550 = vmatpush3.bf16.msra.mxu0 %v1804_v12  ;;  %v1760_v43 = vld [vmem:[#allocation4 + $0x134] ss:$8 sps:$4 sm:$0xff]   ;;  %v1808_v12 = vld [vmem:[#allocation6 + $0x28] sm:$0xff]  }
 0x14b   :  { %1122 = vmatprep.subr.bf16.mxu1 %v1715_v44  ;;  %v1758_v44 = vld [vmem:[#allocation4 + $0x130] ss:$8 sps:$4 sm:$0xff]   ;;  %1551 = vmatprep.subr.bf16.mxu0 %v1805_v9 }
 0x14e   :  { %1123 = vmatpush1.bf16.msra.mxu1 %v1713_v45  ;;  %v1763_v45 = vld [vmem:[#allocation4 + $0x144] ss:$8 sps:$4 sm:$0xff]   ;;  %1552 = vmatpush3.bf16.msra.mxu0 %v1806_v10 }
 0x14f   :  { %1124 = vmatprep.subr.bf16.mxu1 %v1718_v46  ;;  %v1761_v46 = vld [vmem:[#allocation4 + $0x140] ss:$8 sps:$4 sm:$0xff]   ;;  %1553 = vmatprep.subr.bf16.mxu0 %v1807_v11 }
 0x152   :  { %1125 = vmatpush1.bf16.msra.mxu1 %v1716_v47  ;;  %v1766_v47 = vld [vmem:[#allocation4 + $0x154] ss:$8 sps:$4 sm:$0xff]   ;;  %1554 = vmatpush3.bf16.msra.mxu0 %v1808_v12 }
 0x153   :  { %1126 = vmatprep.subr.bf16.mxu1 %v1721_v48  ;;  %v1764_v48 = vld [vmem:[#allocation4 + $0x150] ss:$8 sps:$4 sm:$0xff]  }
 0x156   :  { %1127 = vmatpush1.bf16.msra.mxu1 %v1719_v49  ;;  %v1769_v49 = vld [vmem:[#allocation4 + $0x164] ss:$8 sps:$4 sm:$0xff]  }
 0x157   :  { %1128 = vmatprep.subr.bf16.mxu1 %v1724_v50  ;;  %v1767_v50 = vld [vmem:[#allocation4 + $0x160] ss:$8 sps:$4 sm:$0xff]  }
 0x15a   :  { %1129 = vmatpush1.bf16.msra.mxu1 %v1722_v51  ;;  %v1772_v51 = vld [vmem:[#allocation4 + $0x174] ss:$8 sps:$4 sm:$0xff]  }
 0x15b   :  { %1130 = vmatprep.subr.bf16.mxu1 %v1727_v52  ;;  %v1770_v52 = vld [vmem:[#allocation4 + $0x170] ss:$8 sps:$4 sm:$0xff]  }
 0x15e   :  { %1131 = vmatpush1.bf16.msra.mxu1 %v1725_v53  ;;  %v1775_v53 = vld [vmem:[#allocation4 + $0x184] ss:$8 sps:$4 sm:$0xff]  }
 0x15f   :  { %1132 = vmatprep.subr.bf16.mxu1 %v1730_v54  ;;  %v1773_v54 = vld [vmem:[#allocation4 + $0x180] ss:$8 sps:$4 sm:$0xff]  }
 0x162   :  { %1133 = vmatpush1.bf16.msra.mxu1 %v1728_v55  ;;  %v1778_v55 = vld [vmem:[#allocation4 + $0x194] ss:$8 sps:$4 sm:$0xff]  }
 0x163   :  { %1134 = vmatprep.subr.bf16.mxu1 %v1733_v56  ;;  %v1776_v56 = vld [vmem:[#allocation4 + $0x190] ss:$8 sps:$4 sm:$0xff]  }
 0x166   :  { %1135 = vmatpush1.bf16.msra.mxu1 %v1731_v57  ;;  %v1781_v57 = vld [vmem:[#allocation4 + $0x1a4] ss:$8 sps:$4 sm:$0xff]  }
 0x167   :  { %1136 = vmatprep.subr.bf16.mxu1 %v1736_v58  ;;  %v297_v58 = vsub.s32 2, %v2031_v21  ;;  %v1793_v21 = vld [vmem:[#allocation4 + $0x1e4] ss:$8 sps:$4 sm:$0xff]  }
 0x16a   :  { %1137 = vmatpush1.bf16.msra.mxu1 %v1734_v59  ;;  %v1779_v59 = vld [vmem:[#allocation4 + $0x1a0] ss:$8 sps:$4 sm:$0xff]  }
 0x16b   :  { %1138 = vmatprep.subr.bf16.mxu1 %v1739_v60  ;;  %v1784_v60 = vld [vmem:[#allocation4 + $0x1b4] ss:$8 sps:$4 sm:$0xff]  }
 0x16e   :  { %1139 = vmatpush1.bf16.msra.mxu1 %v1737_v61  ;;  %v298_v61 = vrot.slane %v2047_v13, %v297_v58  ;;  %v1809_v13 = vld [vmem:[#allocation6 + $0x70] sm:$0xff]  }
 0x16f   :  { %1140 = vmatprep.subr.bf16.mxu1 %v1742_v62  ;;  %v1782_v62 = vld [vmem:[#allocation4 + $0x1b0] ss:$8 sps:$4 sm:$0xff]   ;;  %1555 = vmatprep.subr.bf16.mxu0 %v1809_v13 }
 0x170   :  { %1556 = vmatpush3.bf16.msra.mxu0 %v1810_v14 }
 0x172   :  { %1141 = vmatpush1.bf16.msra.mxu1 %v1740_v63  ;;  %v1787_v63 = vld [vmem:[#allocation4 + $0x1c4] ss:$8 sps:$4 sm:$0xff]  }
 0x173   :  { %1142 = vmatprep.subr.bf16.mxu1 %v1745_v0 }
 0x176   :  { %1143 = vmatpush1.bf16.msra.mxu1 %v1743_v1  ;;  %v1785_v1 = vld [vmem:[#allocation4 + $0x1c0] ss:$8 sps:$4 sm:$0xff]  }
 0x177   :  { %1144 = vmatprep.subr.bf16.mxu1 %v1748_v2  ;;  %v1790_v2 = vld [vmem:[#allocation4 + $0x1d4] ss:$8 sps:$4 sm:$0xff]  }
 0x17a   :  { %1145 = vmatpush1.bf16.msra.mxu1 %v1746_v3  ;;  %v1788_v3 = vld [vmem:[#allocation4 + $0x1d0] ss:$8 sps:$4 sm:$0xff]  }
 0x17b   :  { %1155 = vmatprep.subr.bf16.mxu1 %v1751_v4  ;;  %v1791_v4 = vld [vmem:[#allocation4 + $0x1e0] ss:$8 sps:$4 sm:$0xff]  }
 0x210   :  { %v661_v18 = vpop.f32.mrb[0].mxu1  ;;  %v2055_v19 = vpop.f32.mrb[4].mxu0 }
 0x211   :  { %v662_v20 = vadd.f32 %v661_v18, %v290_v15  ;;  %v663_v23 = vpop.f32.mrb[1].mxu1  ;;  %v704_v25 = vpop.f32.mrb[5].mxu0  ;;  %v703_v0 = vadd.f32 %v2055_v19, %v298_v61  ;;  %v1811_v15 = vld [vmem:[#allocation6 + $0x78] sm:$0xff]  }
 0x212   :  { %v664_v26 = vadd.f32 %v663_v23, %v294_v16  ;;  %v705_v27 = vadd.f32 %v704_v25, %v302_v17  ;;  %v665_v28 = vpop.f32.mrb[2].mxu1  ;;  %v706_v29 = vpop.f32.mrb[6].mxu0  ;;  %v1812_v16 = vld [vmem:[#allocation6 + $0x38] sm:$0xff]   ;;  %1557 = vmatprep.subr.bf16.mxu0 %v1811_v15  ;;  %v1461_v17 = vld [vmem:[%s2076_s5 + $0x2] ss:$4 sm:$0x3] }
 0x213   :  { %v666_v30 = vpop.f32.mrb[3].mxu1  ;;  %v707_v31 = vpop.f32.mrb[7].mxu0  ;;  %1817 = vtanh.f32 %v662_v20  ;;  %1558 = vmatpush3.bf16.msra.mxu0 %v1812_v16  ;;  %v787_v18 = vrot.slane %v1461_v17, %v2034_v22  ;;  %v791_v19 = vrot.slane %v1461_v17, %v2040_v24  ;;  %v1526_v22 = vld [vmem:[%s2076_s5 + $0x3] ss:$0 sm:$0xff] }
 0x214   :  { %1819 = vtanh.f32 %v664_v26 }
 0x215   :  { %1821 = vtanh.f32 %v705_v27 }
 0x216   :  { %1823 = vtanh.f32 %v703_v0 }
 0x21d   :  { %v1818_v32 = vpop.eup %1817 }
 0x21e   :  { %v1820_v33 = vpop.eup %1819  ;;  %v713_v37 = vpack.c.bf16 %v1818_v32, %v1818_v32 }
 0x21f   :  { %v1822_v34 = vpop.eup %1821  ;;  %v714_v35 = vpack.c.bf16 %v1820_v33, %v1820_v33 }
 0x220   :  { %v716_v39 = vpack.c.bf16 %v1822_v34, %v1822_v34  ;;  %v1824_v7 = vpop.eup %1823 }
 0x221   :  { %1146 = vmatprep.mubr.bf16.mxu1 %v714_v35  ;;  %v715_v8 = vpack.c.bf16 %v1824_v7, %v1824_v7 }
 0x222   :  { %1147 = vmatmul.mubr.bf16.vlgmr.msra.gmra.mrb[4].mxu1 %v713_v37 }
 0x223   :  { %1156 = vmatpush1.bf16.msra.mxu1 %v1749_v36  ;;  %1187 = vmatprep.mubr.bf16.mxu1 %v716_v39 }
 0x224   :  { %1157 = vmatprep.subr.bf16.mxu1 %v1754_v38 }
 0x227   :  { %1158 = vmatpush1.bf16.msra.mxu1 %v1752_v40 }
 0x228   :  { %1159 = vmatprep.subr.bf16.mxu1 %v1757_v41 }
 0x22b   :  { %1160 = vmatpush1.bf16.msra.mxu1 %v1755_v42 }
 0x22c   :  { %1161 = vmatprep.subr.bf16.mxu1 %v1760_v43 }
 0x22f   :  { %1162 = vmatpush1.bf16.msra.mxu1 %v1758_v44 }
 0x230   :  { %1163 = vmatprep.subr.bf16.mxu1 %v1763_v45 }
 0x233   :  { %1164 = vmatpush1.bf16.msra.mxu1 %v1761_v46 }
 0x234   :  { %1165 = vmatprep.subr.bf16.mxu1 %v1766_v47 }
 0x237   :  { %1166 = vmatpush1.bf16.msra.mxu1 %v1764_v48 }
 0x238   :  { %1167 = vmatprep.subr.bf16.mxu1 %v1769_v49 }
 0x23b   :  { %1168 = vmatpush1.bf16.msra.mxu1 %v1767_v50 }
 0x23c   :  { %1169 = vmatprep.subr.bf16.mxu1 %v1772_v51 }
 0x23f   :  { %1170 = vmatpush1.bf16.msra.mxu1 %v1770_v52 }
 0x240   :  { %1171 = vmatprep.subr.bf16.mxu1 %v1775_v53 }
 0x243   :  { %1172 = vmatpush1.bf16.msra.mxu1 %v1773_v54 }
 0x244   :  { %1173 = vmatprep.subr.bf16.mxu1 %v1778_v55 }
 0x247   :  { %1174 = vmatpush1.bf16.msra.mxu1 %v1776_v56 }
 0x248   :  { %1175 = vmatprep.subr.bf16.mxu1 %v1781_v57 }
 0x24b   :  { %1176 = vmatpush1.bf16.msra.mxu1 %v1779_v59 }
 0x24c   :  { %1177 = vmatprep.subr.bf16.mxu1 %v1784_v60 }
 0x24f   :  { %1178 = vmatpush1.bf16.msra.mxu1 %v1782_v62 }
 0x250   :  { %1179 = vmatprep.subr.bf16.mxu1 %v1787_v63 }
 0x253   :  { %1180 = vmatpush1.bf16.msra.mxu1 %v1785_v1 }
 0x254   :  { %1181 = vmatprep.subr.bf16.mxu1 %v1790_v2 }
 0x257   :  { %1182 = vmatpush1.bf16.msra.mxu1 %v1788_v3 }
 0x258   :  { %1183 = vmatprep.subr.bf16.mxu1 %v1793_v21 }
 0x25b   :  { %1184 = vmatpush1.bf16.msra.mxu1 %v1791_v4 }
 0x25c   :  { %1185 = vmatprep.subr.bf16.mxu1 %v1796_v5 }
 0x25f   :  { %1186 = vmatpush1.bf16.msra.mxu1 %v1794_v6 }
 0x262   :  { %1188 = vmatmul.mubr.bf16.vlgmr.msra.gmra.mrb[4].mxu1 %v715_v8 }
 0x335   :  { %v1189_v20 = vpop.f32.mrb[4].mxu1 }
 0x336   :  { %v1565_v23 = vadd.f32 %v1189_v20, %v787_v18  ;;  %v1191_v25 = vpop.f32.mrb[5].mxu1 }
 0x337   :  { %v1566_v26 = vadd.f32 %v1191_v25, %v791_v19  ;;  %v1193_v27 = vpop.f32.mrb[6].mxu1 }
 0x338   :  { %1825 = vtanh.f32 %v1565_v23  ;;  %v1194_v28 = vpop.f32.mrb[7].mxu1 }
 0x339   :  { %1827 = vtanh.f32 %v1566_v26 }
 0x342   :  { %v1826_v29 = vpop.eup %1825 }
 0x343   :  { %v1828_v30 = vpop.eup %1827  ;;  %v1198_v32 = vpack.c.bf16 %v1826_v29, %v1826_v29 }
 0x344   :  { %v1199_v31 = vpack.c.bf16 %v1828_v30, %v1828_v30 }
 0x346   :  { %1365 = vmatprep.mubr.bf16.mxu0 %v1199_v31 }
 0x347   :  { %1366 = vmatmul.mubr.bf16.vlgmr.msra.gmra.mrb[8].mxu0 %v1198_v32 }
 0x41a   :  { %v1559_v33 = vpop.f32.mrb[8].mxu0 }
 0x41b   :  { %v1560_v24 = vpop.f32.mrb[9].mxu0 }
 0x41c   :  { %v1561_v34 = vadd.f32 %v1560_v24, %v1559_v33  ;;  %v1562_v35 = vpop.f32.mrb[10].mxu0 }
 0x41d   :  { %v1563_v36 = vpop.f32.mrb[11].mxu0 }
 0x41e   :  { %v1368_v37 = vadd.f32 %v1561_v34, %v1526_v22 }
 0x420   :  { %1373 = vst [vmem:[%s2077_s6] sm:$0xff] %v1368_v37 }
 0x421   :  { %1378 = vsyncpa [#allocation3], 1 }
 0x422   :  { %1379 = vsyncpa [#allocation5], 1 }

</bundles_post_ra>
